<compile_context>
chip_gen: v7x
topology: tpu7x:2x2x1
jax: 0.10.0
libtpu: 0.0.40
codegen_flags: <defaults>
</compile_context>

<pallas_src>
import functools
import math

import jax
import jax.numpy as jnp
from jax import lax
from jax.experimental import pallas as pl
from jax.experimental.pallas import tpu as pltpu


# Conservative scoped-VMEM limit that is valid on v5e/v6e (128 MiB) and v7x (64 MiB);
# actual per-call footprint with the tiles below is a few MiB.
_VMEM_LIMIT = 64 * 1024 * 1024


def _pick_tile(dim, preferred):
    """Largest preferred tile that divides `dim`, else the full dim (always legal)."""
    for p in preferred:
        if dim % p == 0:
            return p
    return dim


# ----------------------------------------------------------------------------
# Kernel 1: tiled linear   out = x @ w + b
#   grid = (N//tm, OUT//tn, K//tk); f32 accumulator in VMEM scratch; K axis last.
# ----------------------------------------------------------------------------
def _linear_kernel(x_ref, w_ref, b_ref, o_ref, acc_ref):
    k = pl.program_id(2)

    @pl.when(k == 0)
    def _init():
        acc_ref[...] = jnp.zeros_like(acc_ref)

    acc_ref[...] += jnp.dot(x_ref[...], w_ref[...],
                            preferred_element_type=jnp.float32)

    @pl.when(k == pl.num_programs(2) - 1)
    def _finalize():
        o_ref[...] = (acc_ref[...] + b_ref[...].astype(jnp.float32)).astype(o_ref.dtype)


def linear_pallas(x, w, b, *, tm=None, tn=None, tk=None):
    """x: (N, K), w: (K, OUT), b: (OUT,) -> (N, OUT)."""
    N, K = x.shape
    K2, OUT = w.shape
    assert K == K2
    tm = tm or _pick_tile(N, (256, 128, 64, 32, 16, 8))
    tn = tn or _pick_tile(OUT, (512, 256, 128))
    tk = tk or _pick_tile(K, (512, 256, 128))
    grid = (N // tm, OUT // tn, K // tk)
    b2 = b.reshape(1, OUT)
    return pl.pallas_call(
        _linear_kernel,
        grid=grid,
        in_specs=[
            pl.BlockSpec((tm, tk), lambda i, j, k: (i, k)),
            pl.BlockSpec((tk, tn), lambda i, j, k: (k, j)),
            pl.BlockSpec((1, tn), lambda i, j, k: (0, j)),
        ],
        out_specs=pl.BlockSpec((tm, tn), lambda i, j, k: (i, j)),
        out_shape=jax.ShapeDtypeStruct((N, OUT), x.dtype),
        scratch_shapes=[pltpu.VMEM((tm, tn), jnp.float32)],
        compiler_params=pltpu.CompilerParams(
            dimension_semantics=("parallel", "parallel", "arbitrary"),
            vmem_limit_bytes=_VMEM_LIMIT),
    )(x, w, b2)


# ----------------------------------------------------------------------------
# Kernel 2: dual-input tiled linear for fc2 (no concatenate):
#   out = x1 @ w1 + (relu(x2) if relu_x2 else x2) @ w2 + b
#   x1/w1 are contracted fully at the first K step; x2/w2 are tiled over K2.
# ----------------------------------------------------------------------------
def _linear2_kernel(x1_ref, w1_ref, x2_ref, w2_ref, b_ref, o_ref, acc_ref, *, relu_x2):
    k = pl.program_id(2)

    @pl.when(k == 0)
    def _init():
        acc_ref[...] = jnp.dot(x1_ref[...], w1_ref[...],
                               preferred_element_type=jnp.float32)

    x2 = x2_ref[...]
    if relu_x2:
        x2 = jnp.maximum(x2, 0)          # fused activation on the in-VMEM block
    acc_ref[...] += jnp.dot(x2, w2_ref[...], preferred_element_type=jnp.float32)

    @pl.when(k == pl.num_programs(2) - 1)
    def _finalize():
        o_ref[...] = (acc_ref[...] + b_ref[...].astype(jnp.float32)).astype(o_ref.dtype)


def linear2_pallas(x1, w1, x2, w2, b, *, relu_x2=False, tm=None, tn=None, tk2=None):
    """x1: (N, K1), w1: (K1, OUT), x2: (N, K2), w2: (K2, OUT), b: (OUT,) -> (N, OUT)."""
    N, K1 = x1.shape
    N2, K2 = x2.shape
    OUT = w1.shape[1]
    assert N == N2 and w1.shape[0] == K1 and w2.shape == (K2, OUT)
    tm = tm or _pick_tile(N, (256, 128, 64, 32, 16, 8))
    tn = tn or _pick_tile(OUT, (512, 256, 128))
    tk2 = tk2 or _pick_tile(K2, (512, 256, 128))
    grid = (N // tm, OUT // tn, K2 // tk2)
    b2 = b.reshape(1, OUT)
    return pl.pallas_call(
        functools.partial(_linear2_kernel, relu_x2=relu_x2),
        grid=grid,
        in_specs=[
            pl.BlockSpec((tm, K1), lambda i, j, k: (i, 0)),
            pl.BlockSpec((K1, tn), lambda i, j, k: (0, j)),
            pl.BlockSpec((tm, tk2), lambda i, j, k: (i, k)),
            pl.BlockSpec((tk2, tn), lambda i, j, k: (k, j)),
            pl.BlockSpec((1, tn), lambda i, j, k: (0, j)),
        ],
        out_specs=pl.BlockSpec((tm, tn), lambda i, j, k: (i, j)),
        out_shape=jax.ShapeDtypeStruct((N, OUT), x1.dtype),
        scratch_shapes=[pltpu.VMEM((tm, tn), jnp.float32)],
        compiler_params=pltpu.CompilerParams(
            dimension_semantics=("parallel", "parallel", "arbitrary"),
            vmem_limit_bytes=_VMEM_LIMIT),
    )(x1, w1, x2, w2, b2)


# ----------------------------------------------------------------------------
# Kernel 3: multi-head scaled-dot-product attention on a head-packed layout.
#   grid = (B, T//tq); each step handles ALL heads of one (batch, query-tile).
#   Output block is (tq, E): lane-dense stores, K/V DMA shared across heads.
# ----------------------------------------------------------------------------
def _attn_kernel(q_ref, k_ref, v_ref, o_ref, *, num_heads, head_dim, scaling):
    q = q_ref[0]        # (tq, E)
    k = k_ref[0]        # (S,  E)
    v = v_ref[0]        # (S,  E)
    outs = []
    for h in range(num_heads):      # static unroll over heads
        lo = h * head_dim
        qh = q[:, lo:lo + head_dim]
        kh = k[:, lo:lo + head_dim]
        vh = v[:, lo:lo + head_dim]
        # q @ k^T without materializing a transpose: contract last dim of both.
        s = lax.dot_general(qh, kh, (((1,), (1,)), ((), ())),
                            preferred_element_type=jnp.float32)
        s = s * scaling                               # (tq, S) f32
        m = jnp.max(s, axis=-1, keepdims=True)
        p = jnp.exp(s - m)
        l = jnp.sum(p, axis=-1, keepdims=True)
        oh = jnp.dot(p.astype(vh.dtype), vh, preferred_element_type=jnp.float32)
        outs.append(oh * pl.reciprocal(l))            # EUP reciprocal, not a VPU divide
    o_ref[0] = jnp.concatenate(outs, axis=-1).astype(o_ref.dtype)


def attention_pallas(q, k, v, num_heads, scaling, *, tq=None):
    """q, k, v: (B, seq, E) head-packed -> (B, T, E)."""
    B, T, E = q.shape
    S = k.shape[1]
    head_dim = E // num_heads
    tq = tq or _pick_tile(T, (512, 256, 128))
    grid = (B, T // tq)
    return pl.pallas_call(
        functools.partial(_attn_kernel, num_heads=num_heads,
                          head_dim=head_dim, scaling=scaling),
        grid=grid,
        in_specs=[
            pl.BlockSpec((1, tq, E), lambda b, i: (b, i, 0)),
            pl.BlockSpec((1, S, E), lambda b, i: (b, 0, 0)),
            pl.BlockSpec((1, S, E), lambda b, i: (b, 0, 0)),
        ],
        out_specs=pl.BlockSpec((1, tq, E), lambda b, i: (b, i, 0)),
        out_shape=jax.ShapeDtypeStruct((B, T, E), q.dtype),
        compiler_params=pltpu.CompilerParams(
            dimension_semantics=("parallel", "parallel"),
            vmem_limit_bytes=_VMEM_LIMIT),
    )(q, k, v)


# ----------------------------------------------------------------------------
# Wrapper reproducing MultiheadAttentionEncoder.forward (self-attention path).
# ----------------------------------------------------------------------------
def multihead_attention_encoder(x, params, num_heads, *,
                                fc1_tiles=None, fc2_tiles=None, attn_tiles=None):
    T, B, E = x.shape
    H = num_heads
    hd = E // H
    assert hd * H == E
    scaling = hd ** (-0.5)

    w1, b1, w2, b2 = params["w1"], params["b1"], params["w2"], params["b2"]
    ffn_dim = w1.shape[1] - 3 * E

    # Single layout change up front: (T, B, E) -> (B*T, E).
    xb = jnp.transpose(x, (1, 0, 2)).reshape(B * T, E)

    # fc1 (tiled matmul). The ffn slice stays pre-ReLU; ReLU is fused into fc2.
    ins = linear_pallas(xb, w1, b1, **(fc1_tiles or {}))
    ins3 = ins.reshape(B, T, 3 * E + ffn_dim)

    q = ins3[..., :E]
    k = ins3[..., E:2 * E]
    v = ins3[..., 2 * E:3 * E]
    ffn_raw = ins3[..., 3 * E:]          # pre-ReLU

    attn = attention_pallas(q, k, v, H, scaling, **(attn_tiles or {}))   # (B, T, E)

    # fc2 on (attn, relu(ffn)) without concatenation.
    w2a = w2[:E]
    w2b = w2[E:]
    out = linear2_pallas(attn.reshape(B * T, E), w2a,
                         ffn_raw.reshape(B * T, ffn_dim), w2b, b2,
                         relu_x2=True, **(fc2_tiles or {}))
    out = out.reshape(B, T, E).transpose(1, 0, 2)    # back to (T, B, E)
    return out, None


# ----------------------------------------------------------------------------
# Pure-JAX reference for verification (mirrors the PyTorch forward, eval mode).
# ----------------------------------------------------------------------------
def reference_forward(x, params, num_heads):
    T, B, E = x.shape
    H = num_heads
    hd = E // H
    scaling = hd ** (-0.5)
    w1, b1, w2, b2 = params["w1"], params["b1"], params["w2"], params["b2"]

    ins = x @ w1 + b1
    q = ins[..., :E] * scaling
    k = ins[..., E:2 * E]
    v = ins[..., 2 * E:3 * E]
    ffn_out = jax.nn.relu(ins[..., 3 * E:])

    def to_heads(t):
        return t.reshape(T, B * H, hd).transpose(1, 0, 2)

    qh, kh, vh = to_heads(q), to_heads(k), to_heads(v)
    s = jnp.einsum("btd,bsd->bts", qh, kh)
    p = jax.nn.softmax(s, axis=-1)
    a = jnp.einsum("bts,bsd->btd", p, vh)
    a = a.transpose(1, 0, 2).reshape(T, B, E)
    cat = jnp.concatenate([a, ffn_out], axis=-1)
    return cat @ w2 + b2


# ----------------------------------------------------------------------------
# Deterministic parameter construction (kaiming-uniform-style, synthetic).
# ----------------------------------------------------------------------------
def make_params(key, embed_dim, ffn_dim):
    E, F = embed_dim, ffn_dim
    k1, k2, k3, k4 = jax.random.split(key, 4)

    def kaiming_uniform_T(k, fan_in, fan_out, a=1.0):
        gain = math.sqrt(2.0 / (1.0 + a * a))
        bound = gain * math.sqrt(3.0 / fan_in)
        # stored transposed relative to PyTorch: shape (fan_in, fan_out)
        return jax.random.uniform(k, (fan_in, fan_out), jnp.float32, -bound, bound)

    def bias_uniform(k, fan_in, fan_out):
        bound = 1.0 / math.sqrt(fan_in)
        return jax.random.uniform(k, (fan_out,), jnp.float32, -bound, bound)

    return {
        "w1": kaiming_uniform_T(k1, E, 3 * E + F),
        "b1": bias_uniform(k2, E, 3 * E + F),
        "w2": kaiming_uniform_T(k3, E + F, E),
        "b2": bias_uniform(k4, E + F, E),
    }


if __name__ == "__main__":
    tgt_len, bsz = 16, 4
    embed_dim, num_heads, ffn_dim = 256, 4, 512

    key = jax.random.PRNGKey(0)
    kx, kp = jax.random.split(key)
    x = jax.random.normal(kx, (tgt_len, bsz, embed_dim), jnp.float32)
    params = make_params(kp, embed_dim, ffn_dim)

    out, attn_weights = multihead_attention_encoder(
        x, params, num_heads,
        fc1_tiles=dict(tk=128),     # exercise the K-accumulation grid axis
        fc2_tiles=dict(tk2=128))    # exercise the dual-input K loop
    out = jax.block_until_ready(out)

    ref = reference_forward(x, params, num_heads)
    assert out.shape == (tgt_len, bsz, embed_dim)
    assert attn_weights is None
    assert jnp.allclose(out, ref, atol=2e-3, rtol=2e-3), "Pallas output mismatch vs reference"

    print("KERNEL_OK")
</pallas_src>

<mosaic_0001>
module attributes {stable_mosaic.version = 11 : i64} {
  func.func @_linear_kernel(%arg0: i32, %arg1: i32, %arg2: i32, %arg3: memref<64x128xf32, #tpu.memory_space<vmem>>, %arg4: memref<128x256xf32, #tpu.memory_space<vmem>>, %arg5: memref<1x256xf32, #tpu.memory_space<vmem>>, %arg6: memref<64x256xf32, #tpu.memory_space<vmem>>, %arg7: memref<64x256xf32, #tpu.memory_space<vmem>>) attributes {dimension_semantics = [#tpu.dimension_semantics<parallel>, #tpu.dimension_semantics<parallel>, #tpu.dimension_semantics<arbitrary>], iteration_bounds = array<i64: 1, 5, 2>, scalar_prefetch = 0 : i64, scratch_operands = 1 : i64, tpu.core_type = #tpu.core_type<tc>, window_params = [{transform_indices = @transform_0, window_bounds = array<i64: 64, 128>}, {transform_indices = @transform_1, window_bounds = array<i64: 128, 256>}, {transform_indices = @transform_2, window_bounds = array<i64: 1, 256>}, {transform_indices = @transform_3, window_bounds = array<i64: 64, 256>}]} {
    %c0_i32 = arith.constant 0 : i32
    %0 = arith.cmpi eq, %arg2, %c0_i32 : i32
    %1 = arith.extui %0 : i1 to i32
    %c0_i32_0 = arith.constant 0 : i32
    %2 = arith.cmpi ne, %1, %c0_i32_0 : i32
    scf.if %2 {
      %cst_9 = arith.constant 0.000000e+00 : f32
      %12 = vector.broadcast %cst_9 : f32 to vector<64x256xf32>
      %c0_10 = arith.constant 0 : index
      %c0_11 = arith.constant 0 : index
      %13 = vector.load %arg7[%c0_10, %c0_11] : memref<64x256xf32, #tpu.memory_space<vmem>>, vector<64x256xf32>
      tpu.vector_store %arg7[%c0_10, %c0_11], %12 {strides = array<i32>} : memref<64x256xf32, #tpu.memory_space<vmem>>, vector<64x256xf32>,
    } else {
    }
    %c0 = arith.constant 0 : index
    %c0_1 = arith.constant 0 : index
    %3 = vector.load %arg7[%c0, %c0_1] : memref<64x256xf32, #tpu.memory_space<vmem>>, vector<64x256xf32>
    %c0_2 = arith.constant 0 : index
    %c0_3 = arith.constant 0 : index
    %4 = vector.load %arg3[%c0_2, %c0_3] : memref<64x128xf32, #tpu.memory_space<vmem>>, vector<64x128xf32>
    %c0_4 = arith.constant 0 : index
    %c0_5 = arith.constant 0 : index
    %5 = vector.load %arg4[%c0_4, %c0_5] : memref<128x256xf32, #tpu.memory_space<vmem>>, vector<128x256xf32>
    %cst = arith.constant dense<0.000000e+00> : vector<64x256xf32>
    %6 = tpu.matmul %4, %5, %cst {dimension_numbers = #tpu.dot_dimension_numbers<[1], [0], [0], [1], [0, 0, 1, 1], [], []>} : vector<64x128xf32>, vector<128x256xf32>, vector<64x256xf32> -> vector<64x256xf32>
    %7 = arith.addf %3, %6 : vector<64x256xf32>
    %c0_6 = arith.constant 0 : index
    %c0_7 = arith.constant 0 : index
    %8 = vector.load %arg7[%c0_6, %c0_7] : memref<64x256xf32, #tpu.memory_space<vmem>>, vector<64x256xf32>
    tpu.vector_store %arg7[%c0_6, %c0_7], %7 {strides = array<i32>} : memref<64x256xf32, #tpu.memory_space<vmem>>, vector<64x256xf32>,
    %c1_i32 = arith.constant 1 : i32
    %9 = arith.cmpi eq, %arg2, %c1_i32 : i32
    %10 = arith.extui %9 : i1 to i32
    %c0_i32_8 = arith.constant 0 : i32
    %11 = arith.cmpi ne, %10, %c0_i32_8 : i32
    scf.if %11 {
      %c0_9 = arith.constant 0 : index
      %c0_10 = arith.constant 0 : index
      %12 = vector.load %arg7[%c0_9, %c0_10] : memref<64x256xf32, #tpu.memory_space<vmem>>, vector<64x256xf32>
      %c0_11 = arith.constant 0 : index
      %c0_12 = arith.constant 0 : index
      %13 = vector.load %arg5[%c0_11, %c0_12] : memref<1x256xf32, #tpu.memory_space<vmem>>, vector<1x256xf32>
      %14 = vector.broadcast %13 : vector<1x256xf32> to vector<64x256xf32>
      %15 = arith.addf %12, %14 : vector<64x256xf32>
      %c0_13 = arith.constant 0 : index
      %c0_14 = arith.constant 0 : index
      %16 = vector.load %arg6[%c0_13, %c0_14] : memref<64x256xf32, #tpu.memory_space<vmem>>, vector<64x256xf32>
      tpu.vector_store %arg6[%c0_13, %c0_14], %15 {strides = array<i32>} : memref<64x256xf32, #tpu.memory_space<vmem>>, vector<64x256xf32>,
    } else {
    }
    return
  }
  func.func @transform_0(%arg0: i32, %arg1: i32, %arg2: i32) -> (i32, i32) {
    %c0_i32 = arith.constant 0 : i32
    return %arg0, %arg2 : i32, i32
  }
  func.func @transform_1(%arg0: i32, %arg1: i32, %arg2: i32) -> (i32, i32) {
    %c0_i32 = arith.constant 0 : i32
    return %arg2, %arg1 : i32, i32
  }
  func.func @transform_2(%arg0: i32, %arg1: i32, %arg2: i32) -> (i32, i32) {
    %c0_i32 = arith.constant 0 : i32
    %c0_i32_0 = arith.constant 0 : i32
    return %c0_i32, %arg1 : i32, i32
  }
  func.func @transform_3(%arg0: i32, %arg1: i32, %arg2: i32) -> (i32, i32) {
    %c0_i32 = arith.constant 0 : i32
    return %arg0, %arg1 : i32, i32
  }
}

</mosaic_0001>

<bundles_post_ra>
// kernel: tpu_custom_call.1
= control target key start
LH: loop header
LB: loop body
LE: loop exit
PB: predicated region body
PF: predicated region fallthrough
CT: control target
= control target key end

     0   :  { %s1745_s0 = inlined_call_operand.hbm [shape: f32[64,256], index: 0, kind: input, shape index: {}]   ;;  %s1746_s1 = inlined_call_operand.hbm [shape: f32[256,1280], index: 1, kind: input, shape index: {}]   ;;  %s1747_s2 = inlined_call_operand.hbm [shape: f32[1,1280], index: 2, kind: input, shape index: {}]   ;;  %s1748_s3 = inlined_call_operand.hbm [shape: f32[64,1280], index: 3, kind: output, shape index: {}]  }
   0x1   :  { %1761 = sst [smem:[#allocation20_spill]] %s1745_s0 }
   0x2   :  { %1762 = sst [smem:[#allocation21_spill]] %s1746_s1 }
   0x3   :  { %1763 = sst [smem:[#allocation22_spill]] %s1748_s3 }
   0x4   :  { %8 = vsyncpa [#allocation4], 0 }
   0x5   :  { %10 = vsyncpa [#allocation4 + $0x1], 0 }
   0x6   :  { %11 = vsyncpa [#allocation7], 0 }
   0x7   :  { %13 = vsyncpa [#allocation7 + $0x1], 0 }
   0x8   :  { %14 = vsyncpa [#allocation5], 0 }
   0x9   :  { %16 = vsyncpa [#allocation5 + $0x1], 0  ;;  %s1243_s12 = smov 0   ;;  %s1245_s13 = smov 0  }
   0xa   :  { %s1247_s14 = smov 0   ;;  %s1249_s15 = smov 0  }
   0xb   :  { %s1251_s16 = smov 0   ;;  %s1253_s17 = smov 0  }
   0xc   :  { %s1255_s18 = smov 0   ;;  %s1257_s19 = smov 0  }
   0xd   :  { %s1259_s20 = smov 0   ;;  %s1261_s21 = smov 0  }
   0xe   :  { %s1263_s22 = smov 0   ;;  %s1265_s23 = smov 0  }
   0xf   :  { %s1267_s24 = smov 0   ;;  %s1269_s25 = smov 0  }
  0x10 LB: > { %1764 = sst [smem:[#allocation14_spill]] %s1195_s22  ;;  %s34_s26 = sadd.s32 1, %s1199_s23  ;;  %s1207_s25 = sphi %s1269_s25, %s22_s25   ;;  %s1203_s24 = sphi %s1267_s24, %s1807_s24   ;;  %s1199_s23 = sphi %s1265_s23, %s1806_s23   ;;  %s1195_s22 = sphi %s1263_s22, %s1805_s22   ;;  %s1191_s21 = sphi %s1261_s21, %s1804_s21   ;;  %s1187_s20 = sphi %s1259_s20, %s1816_s20   ;;  %s1183_s19 = sphi %s1257_s19, %s1815_s19   ;;  %s1179_s18 = sphi %s1255_s18, %s1814_s18   ;;  %s1175_s17 = sphi %s1253_s17, %s1813_s17   ;;  %s1171_s16 = sphi %s1251_s16, %s1812_s16   ;;  %s1167_s15 = sphi %s1249_s15, %s1811_s15   ;;  %s1163_s14 = sphi %s1247_s14, %s1810_s14   ;;  %s1159_s13 = sphi %s1245_s13, %s1809_s13   ;;  %s1155_s12 = sphi %s1243_s12, %s1808_s12  }
  0x11   : > { %1765 = sst [smem:[#allocation15_spill]] %s1199_s23  ;;  %p1315_p0 = scmp.ge.s32.totalorder %s34_s26, 2 }
  0x12   : > { %1766 = sst [smem:[#allocation16_spill]] %s1203_s24  ;;  %p1752_p1 = scmp.eq.s32.totalorder %s1207_s25, 0 }
  0x13   : > { %p85_p2 = scmp.ne.s32.totalorder %s1175_s17, %s1171_s16  ;;  %s1818_s26 = smov (%p1315_p0, %s34_s26), 0 }
  0x14   : > { %1768 = sst [smem:[#allocation17_spill]] %s1818_s26  ;;  %s1333_s30 = ssub.s32 %s1199_s23, %s1818_s26 }
  0x15   : > { %p87_p3 = por %p85_p2, %p1752_p1  ;;  %p1751_p6 = scmp.lt.s32.totalorder %s1207_s25, 10 }
  0x16   : > { %s192_s4 = sand.u32 1, %s1207_s25   ;;  %s194_s5 = sand.u32 1, %s1175_s17  }
  0x17   : > { %s746_s6 = sshll.u32 %s194_s5, 8  ;;  %s748_s7 = sshll.u32 %s1203_s24, 1 }
  0x18   : > { %s816_s8 = smul.u32 160, %s1199_s23  ;;  %s196_s9 = scalar_lea.vmem [#allocation6], %s746_s6 }
  0x19   : > { %s206_s10 = sshll.u32 %s196_s9, 4  ;;  %p1343_p7 = pnand %p1751_p6, %p87_p3  ;;  %s1347_s10 = int_to_ptr.vmem [resolvable:$true] %s206_s10 }
  0x1a   : > { %s203_s29 = sadd.s32 %s816_s8, %s748_s7  ;;  %s1770_s1 = sld [smem:[#allocation21_spill]] }
  0x1b   : > { %s750_s27 = sshll.u32 %s203_s29, 7  ;;  %s1355_s5 = scalar_lea.sflag [#allocation7], %s192_s4 }
  0x1c   : > { %p965_p10 = pneg %p1343_p7 }
  0x20   : > { %s1352_s22 = scalar_lea.hbm %s1770_s1, %s750_s27  ;;  %s968_s3 = scalar_lea.hbm %s1770_s1, 40960 }
  0x21   : > { %s963_s6 = scalar_lea.hbm %s1352_s22, 4096  ;;  %p969_p13 = scmp.lt.u32.totalorder %s1352_s22, %s1770_s1 }
  0x22   : > { %p964_p9 = scmp.ne.s32.totalorder %s1352_s22, %s963_s6  ;;  %p970_p2 = scmp.lt.u32.totalorder %s968_s3, %s963_s6 }
  0x23   : > { %p972_p4 = scmp.lt.u32.totalorder %s963_s6, %s1352_s22 }
  0x24   : > { %p966_p11 = pnand %p965_p10, %p964_p9  ;;  %p971_p3 = por %p970_p2, %p969_p13 }
  0x26   : > { %p967_p12 = pneg %p966_p11  ;;  %p973_p6 = por %p972_p4, %p971_p3 }
  0x28   : > { %p974_p1 = pnand %p973_p6, %p967_p12 }
  0x2a   : > { %977 = shalt.err (!%p974_p1)
}
  0x2b   : > { %s978_s4 = scalar_lea.vmem %s1347_s10, 4096  ;;  %s1209_s8 = smov [#allocation6]  }
  0x2c   : > { %p979_p9 = scmp.ne.s32.totalorder %s1347_s10, %s978_s4  ;;  %s983_s9 = sshll.u32 %s1209_s8, 4  ;;  %s984_s9 = int_to_ptr.vmem [resolvable:$false] %s983_s9 }
  0x2d   : > { %s985_s29 = scalar_lea.vmem %s984_s9, 8192  ;;  %p986_p8 = scmp.lt.s32.totalorder %s1347_s10, %s984_s9 }
  0x2e   : > { %p981_p11 = pnand %p979_p9, %p965_p10  ;;  %p987_p13 = scmp.lt.s32.totalorder %s985_s29, %s978_s4 }
  0x30   : > { %p982_p5 = pneg %p981_p11  ;;  %p988_p2 = por %p987_p13, %p986_p8 }
  0x32   : > { %p989_p4 = pnand %p988_p2, %p982_p5 }
  0x34   : > { %992 = shalt.err (!%p989_p4)
}
  0x35   : > { %s1210_s6 = smov 1280   ;;  %s1753_s7 = smov 256  }
  0x36   : > { %s1212_s3 = smov 16   ;;  %p233_p1 = scmp.lt.s32.totalorder %s1207_s25, 11 }
  0x37   : > { %831 = dma.hbm_to_vmem [thread:$0]  (!%p1343_p7), %s1352_s22, 4096, %s1347_s10, %s1355_s5, %s1210_s6, %s1753_s7, %s1212_s3  }
  0x38   : > { %p1771_p5 = scmp.ge.s32.totalorder %s1207_s25, 1  ;;  %s50_s27 = sadd.s32 1, %s1187_s20 }
  0x39   : > { %p57_p8 = scmp.ne.s32.totalorder %s1187_s20, %s1183_s19  ;;  %p1773_p10 = scmp.eq.s32.totalorder %s1333_s30, 0 }
  0x3a   : > { %p1387_p6 = pnand %p1771_p5, %p233_p1  ;;  %p1775_p12 = scmp.eq.s32.totalorder %s1207_s25, 0 }
  0x3b   : > { %s1397_s4 = scalar_select %p1773_p10, %s1187_s20, %s50_s27  }
  0x3c   : > { %s1772_s26 = scalar_select %p1387_p6, 1, 0 }
  0x3d   : > { %1774 = sst [smem:[#allocation18_spill]] %s1397_s4  ;;  %p59_p3 = por %p1775_p12, %p57_p8 }
  0x3e   : > { %s169_s8 = sand.u32 1, %s1187_s20   ;;  %s745_s9 = sshll.u32 %s1199_s23, 7 }
  0x3f   : > { %s744_s29 = sshll.u32 %s169_s8, 6  ;;  %s1776_s0 = sld [smem:[#allocation20_spill]] }
  0x40   : > { %s173_s10 = scalar_lea.vmem [#allocation3], %s744_s29  ;;  %p1777_p7 = scmp.lt.s32.totalorder %s1207_s25, 10 }
  0x41   : > { %s182_s6 = sshll.u32 %s173_s10, 4  ;;  %s1418_s27 = scalar_lea.sflag [#allocation4], %s169_s8  ;;  %s1416_s6 = int_to_ptr.vmem [resolvable:$true] %s182_s6 }
  0x42   : > { %p1412_p11 = pnand %p1777_p7, %p59_p3 }
  0x44   : > { %p995_p2 = pneg %p1412_p11 }
  0x45   : > { %s1408_s22 = scalar_lea.hbm %s1776_s0, %s745_s9  ;;  %s998_s11 = scalar_lea.hbm %s1776_s0, 2048 }
  0x46   : > { %s993_s1 = scalar_lea.hbm %s1408_s22, 1024  ;;  %p999_p5 = scmp.lt.u32.totalorder %s1408_s22, %s1776_s0 }
  0x47   : > { %p994_p13 = scmp.ne.s32.totalorder %s1408_s22, %s993_s1  ;;  %p1000_p8 = scmp.lt.u32.totalorder %s998_s11, %s993_s1 }
  0x48   : > { %p1002_p12 = scmp.lt.u32.totalorder %s993_s1, %s1408_s22 }
  0x49   : > { %p996_p4 = pnand %p995_p2, %p994_p13  ;;  %p1001_p10 = por %p1000_p8, %p999_p5 }
  0x4b   : > { %p997_p1 = pneg %p996_p4  ;;  %p1003_p3 = por %p1002_p12, %p1001_p10 }
  0x4d   : > { %p1004_p7 = pnand %p1003_p3, %p997_p1 }
  0x4f   : > { %1007 = shalt.err (!%p1004_p7)
}
  0x50   : > { %s1008_s8 = scalar_lea.vmem %s1416_s6, 1024  ;;  %s1213_s9 = smov [#allocation3]  }
  0x51   : > { %p1009_p13 = scmp.ne.s32.totalorder %s1416_s6, %s1008_s8  ;;  %s1013_s29 = sshll.u32 %s1213_s9, 4  ;;  %s1014_s29 = int_to_ptr.vmem [resolvable:$false] %s1013_s29 }
  0x52   : > { %s1015_s7 = scalar_lea.vmem %s1014_s29, 2048  ;;  %p1016_p6 = scmp.lt.s32.totalorder %s1416_s6, %s1014_s29 }
  0x53   : > { %p1011_p4 = pnand %p1009_p13, %p995_p2  ;;  %p1017_p5 = scmp.lt.s32.totalorder %s1015_s7, %s1008_s8 }
  0x55   : > { %p1012_p9 = pneg %p1011_p4  ;;  %p1018_p8 = por %p1017_p5, %p1016_p6 }
  0x57   : > { %p1019_p10 = pnand %p1018_p8, %p1012_p9 }
  0x59   : > { %1022 = shalt.err (!%p1019_p10)
}
  0x5a   : > { %s1214_s1 = smov 128   ;;  %s1215_s11 = smov 8  }
  0x5b   : > { %s1779_s10 = smov 256   ;;  %s1448_s8 = sadd.s32 4294967295, %s1207_s25  }
  0x5c   : > { %828 = dma.hbm_to_vmem [thread:$0]  (!%p1412_p11), %s1408_s22, 1024, %s1416_s6, %s1418_s27, %s1779_s10, %s1214_s1, %s1215_s11  }
  0x5d   : > { %s741_s9 = sadd.s32 4294967294, %s1207_s25   ;;  %s1780_s29 = sadd.s32 1, %s1203_s24 }
  0x5e   : > { %s1820_s29 = smov (!%p1315_p0, %s1780_s29), %s1203_s24  ;;  %p64_p6 = scmp.eq.s32.totalorder %s1448_s8, 0 }
  0x5f   : > { %s104_s3 = sadd.s32 1, %s1163_s14  ;;  %p39_p9 = scmp.ge.s32.totalorder %s1820_s29, 5 }
  0x60   : > { %p111_p11 = scmp.ne.s32.totalorder %s1163_s14, %s1159_s13  ;;  %p1781_p2 = scmp.ne.s32.totalorder %s1183_s19, %s1179_s18 }
  0x61   : > { %p1783_p12 = scmp.ne.s32.totalorder %s1171_s16, %s1167_s15  ;;  %s1822_s29 = smov (%p39_p9, %s1820_s29), 0 }
  0x62   : > { %p1465_p1 = por %p64_p6, %p1781_p2  ;;  %1785 = sst [smem:[#allocation19_spill]] %s1822_s29 }
  0x63   : > { %p1474_p0 = por %p1783_p12, %p64_p6  ;;  %p1786_p3 = scmp.eq.s32.totalorder %s1207_s25, 0 }
  0x64   : > { %s1782_s22 = scalar_select %p1465_p1, 1, 0 }
  0x65   : > { %s1784_s28 = scalar_select %p1474_p0, 1, 0 }
  0x66   : > { %p1485_p7 = por %p111_p11, %p1786_p3  ;;  %p117_p13 = scmp.ne.s32.totalorder %s1159_s13, %s1155_s12 }
  0x67   : > { %s74_s6 = ssub.s32 %s1203_s24, %s1822_s29  ;;  %p143_p4 = scmp.eq.s32.totalorder %s1448_s8, 9 }
  0x68   : > { %s75_s15 = sor.u32 %s74_s6, %s1333_s30  ;;  %p102_p5 = scmp.eq.s32.totalorder %s74_s6, 0 }
  0x69   : > { %p76_p8 = scmp.eq.s32.totalorder %s75_s15, 0  ;;  %p1500_p10 = por %p117_p13, %p64_p6 }
  0x6a   : > { %s1505_s7 = scalar_select %p102_p5, %s1163_s14, %s104_s3  }
  0x6b   : > { %s1788_s27 = scalar_select %p1500_p10, 1, 0 }
  0x6c   : > { %s1789_s1 = sadd.s32 1, %s1175_s17  ;;  %p1515_p9 = por %p143_p4, %p111_p11 }
  0x6d   : > { %s1510_s11 = scalar_select %p76_p8, %s1175_s17, %s1789_s1  }
  0x6e   : > { %s1790_s10 = scalar_select %p1515_p9, 1, 0 }
  0x6f   : > { %p149_p2 = scmp.eq.s32.totalorder %s741_s9, 9  ;;  %s218_s30 = sand.u32 1, %s1163_s14  }
  0x70   : > { %s766_s6 = sshll.u32 %s1203_s24, 5  ;;  %s751_s0 = sshll.u32 %s218_s30, 1 }
  0x71   : > { %p1524_p12 = por %p149_p2, %p117_p13  ;;  %s1531_s23 = scalar_lea.hbm %s1747_s2, %s766_s6 }
  0x72   : > { %s220_s1 = scalar_lea.vmem [#allocation8], %s751_s0  ;;  %p1792_p6 = scmp.lt.s32.totalorder %s1207_s25, 10 }
  0x73   : > { %s1791_s15 = scalar_select %p1524_p12, 1, 0 }
  0x74   : > { %s228_s4 = sshll.u32 %s220_s1, 4  ;;  %p1537_p11 = pnand %p1792_p6, %p1485_p7  ;;  %s229_s4 = int_to_ptr.vmem [resolvable:$true] %s228_s4 }
  0x75   : > { %s1023_s30 = scalar_lea.hbm %s1531_s23, 32  ;;  %s1028_s18 = scalar_lea.hbm %s1747_s2, 160 }
  0x76   : > { %p1024_p3 = scmp.ne.s32.totalorder %s1531_s23, %s1023_s30  ;;  %p1025_p13 = pneg %p1537_p11 }
  0x77   : > { %p1029_p7 = scmp.lt.u32.totalorder %s1531_s23, %s1747_s2  ;;  %p1030_p8 = scmp.lt.u32.totalorder %s1028_s18, %s1023_s30 }
  0x78   : > { %p1026_p4 = pnand %p1025_p13, %p1024_p3  ;;  %p1032_p6 = scmp.lt.u32.totalorder %s1023_s30, %s1531_s23 }
  0x79   : > { %p1031_p2 = por %p1030_p8, %p1029_p7 }
  0x7a   : > { %p1027_p5 = pneg %p1026_p4 }
  0x7b   : > { %p1033_p12 = por %p1032_p6, %p1031_p2 }
  0x7d   : > { %p1034_p9 = pnand %p1033_p12, %p1027_p5 }
  0x7f   : > { %1037 = shalt.err (!%p1034_p9)
}
  0x80   : > { %s1038_s1 = scalar_lea.vmem %s229_s4, 32  ;;  %s1216_s24 = smov [#allocation8]  }
  0x81   : > { %p1039_p10 = scmp.ne.s32.totalorder %s229_s4, %s1038_s1  ;;  %s1043_s29 = sshll.u32 %s1216_s24, 4  ;;  %s1044_s29 = int_to_ptr.vmem [resolvable:$false] %s1043_s29 }
  0x82   : > { %s1045_s0 = scalar_lea.vmem %s1044_s29, 64  ;;  %p1046_p0 = scmp.lt.s32.totalorder %s229_s4, %s1044_s29 }
  0x83   : > { %p1041_p3 = pnand %p1039_p10, %p1025_p13  ;;  %p1047_p1 = scmp.lt.s32.totalorder %s1045_s0, %s1038_s1 }
  0x85   : > { %p1042_p4 = pneg %p1041_p3  ;;  %p1048_p7 = por %p1047_p1, %p1046_p0 }
  0x87   : > { %p1049_p8 = pnand %p1048_p7, %p1042_p4 }
  0x89   : > { %1052 = shalt.err (!%p1049_p8)
}
  0x8a   : > { %834 = dma.hbm_to_vmem [thread:$0]  (!%p1537_p11), %s1531_s23, 32, %s229_s4, %s1355_s5  }
  0x8b   : > { %p1794_p9 = scmp.ne.s32.totalorder %s1772_s26, 0 }
  0x8c   : > { %s239_s30 = sand.u32 (!%p1794_p9), 1, %s1183_s19   ;;  %p1795_p10 = scmp.ne.s32.totalorder (!%p1794_p9), %s1782_s22, 0 }
  0x8d   : > { %237 = sbr.rel (%p1794_p9) target bundleno = 471 (0x1d7), region = 32  ;;  %s755_s18 = sshll.u32 (!%p1794_p9), %s239_s30, 6 }
  0x8e   : > { %s240_s24 = scalar_lea.sflag (!%p1794_p9), [#allocation4], %s239_s30  ;;  %s1566_s6 = scalar_lea.vmem (!%p1794_p9), [#allocation3], %s755_s18 }
  0x94   : > { %1138 = dma.done.wait (%p1795_p10), %s240_s24, 1024  }
  0x95   : > { %1140 = vsyncadd (%p1795_p10), %s240_s24, 4294966272  ;;  %s248_s9 = sand.u32 1, %s1448_s8   ;;  %s250_s23 = sand.u32 1, %s1171_s16  }
  0x96   : > { %s756_s5 = sshll.u32 %s250_s23, 8  ;;  %s249_s26 = scalar_lea.sflag [#allocation7], %s248_s9 }
  0x97   : > { %s1574_s4 = scalar_lea.vmem [#allocation6], %s756_s5  ;;  %p1796_p1 = scmp.ne.s32.totalorder %s1784_s28, 0 }
  0x99   : > { %1142 = dma.done.wait (%p1796_p1), %s249_s26, 4096  }
  0x9a   : > { %1144 = vsyncadd (%p1796_p1), %s249_s26, 4294963200  ;;  %s1581_s3 = sand.u32 1, %s1159_s13   ;;  %p1797_p0 = scmp.ne.s32.totalorder %s1788_s27, 0 }
  0x9b   : > { %s757_s22 = sshll.u32 %s1581_s3, 1 }
  0x9c   : > { %s1584_s1 = scalar_lea.vmem [#allocation8], %s757_s22 }
  0x9d   : > { %1146 = dma.done.wait (%p1797_p0), %s249_s26, 32  }
  0x9e   : > { %1148 = vsyncadd (%p1797_p0), %s249_s26, 4294967264  ;;  %s758_s8 = sshll.u32 %s1581_s3, 7  ;;  %p759_p12 = scmp.ne.s32.totalorder %s1191_s21, 0 }
  0x9f   : > { %s1591_s29 = scalar_lea.vmem [#allocation9], %s758_s8  ;;  %v1217_v0 = vmov (!%p759_p12), 0.0  }
  0xa0   : > { %303 = sbr.rel (%p759_p12) target bundleno = 168 (0xa8), region = 48  ;;  %304 = vst [vmem:[#allocation2] sm:$0xff] (!%p759_p12), %v1217_v0  ;;  %305 = vst [vmem:[#allocation2 + $0x8] sm:$0xff] (!%p759_p12), %v1217_v0 }
  0xa1   : > { %306 = vst [vmem:[#allocation2 + $0x10] sm:$0xff] (!%p759_p12), %v1217_v0  ;;  %307 = vst [vmem:[#allocation2 + $0x18] sm:$0xff] (!%p759_p12), %v1217_v0 }
  0xa2   : > { %308 = vst [vmem:[#allocation2 + $0x20] sm:$0xff] (!%p759_p12), %v1217_v0  ;;  %309 = vst [vmem:[#allocation2 + $0x28] sm:$0xff] (!%p759_p12), %v1217_v0 }
  0xa3   : > { %310 = vst [vmem:[#allocation2 + $0x30] sm:$0xff] (!%p759_p12), %v1217_v0  ;;  %311 = vst [vmem:[#allocation2 + $0x38] sm:$0xff] (!%p759_p12), %v1217_v0 }
  0xa4   : > { %312 = vst [vmem:[#allocation2 + $0x40] sm:$0xff] (!%p759_p12), %v1217_v0  ;;  %313 = vst [vmem:[#allocation2 + $0x48] sm:$0xff] (!%p759_p12), %v1217_v0 }
  0xa5   : > { %314 = vst [vmem:[#allocation2 + $0x50] sm:$0xff] (!%p759_p12), %v1217_v0  ;;  %315 = vst [vmem:[#allocation2 + $0x58] sm:$0xff] (!%p759_p12), %v1217_v0 }
  0xa6   : > { %316 = vst [vmem:[#allocation2 + $0x60] sm:$0xff] (!%p759_p12), %v1217_v0  ;;  %317 = vst [vmem:[#allocation2 + $0x68] sm:$0xff] (!%p759_p12), %v1217_v0 }
  0xa7   : > { %318 = vst [vmem:[#allocation2 + $0x70] sm:$0xff] %v1217_v0  ;;  %319 = vst [vmem:[#allocation2 + $0x78] sm:$0xff] %v1217_v0 }
  0xa8 PF: > { %v345_v1 = vld [vmem:[%s1574_s4 + $0x8] sm:$0xff]  ;;  %v347_v2 = vld [vmem:[%s1574_s4 + $0x18] sm:$0xff]  ;;  %v344_v3 = vld [vmem:[%s1574_s4] sm:$0xff]  ;;  %v1218_v8 = vmov 0.0   ;;  %p760_p11 = scmp.ne.s32.totalorder %s1191_s21, 1 }
  0xa9   : > { %v768_v4 = vpack.c.bf16 %v347_v2, %v345_v1  ;;  %v346_v5 = vld [vmem:[%s1574_s4 + $0x10] sm:$0xff]  ;;  %v349_v6 = vld [vmem:[%s1574_s4 + $0x28] sm:$0xff]  ;;  %v351_v7 = vld [vmem:[%s1574_s4 + $0x38] sm:$0xff]  ;;  %440 = vmatprep.mubr.f32.mxu0 %v1218_v8  ;;  %464 = vmatprep.mubr.f32.mxu1 %v1218_v8 }
  0xaa   : > { %v770_v9 = vpack.c.bf16 %v346_v5, %v344_v3  ;;  %v772_v10 = vpack.c.bf16 %v351_v7, %v349_v6  ;;  %v348_v11 = vld [vmem:[%s1574_s4 + $0x20] sm:$0xff]  ;;  %v350_v12 = vld [vmem:[%s1574_s4 + $0x30] sm:$0xff]  ;;  %v353_v13 = vld [vmem:[%s1574_s4 + $0x48] sm:$0xff] }
  0xab   : > { %769 = vmatprep.subr.bf16.mxu0 %v768_v4  ;;  %800 = vmatprep.subr.bf16.mxu1 %v768_v4  ;;  %v355_v14 = vld [vmem:[%s1574_s4 + $0x58] sm:$0xff]  ;;  %v774_v15 = vpack.c.bf16 %v350_v12, %v348_v11  ;;  %v352_v17 = vld [vmem:[%s1574_s4 + $0x40] sm:$0xff]  ;;  %v354_v18 = vld [vmem:[%s1574_s4 + $0x50] sm:$0xff] }
  0xac   : > { %771 = vmatpush1.bf16.msra.mxu0 %v770_v9  ;;  %808 = vmatpush1.bf16.msra.mxu1 %v770_v9  ;;  %v776_v16 = vpack.c.bf16 %v355_v14, %v353_v13  ;;  %v357_v19 = vld [vmem:[%s1574_s4 + $0x68] sm:$0xff]  ;;  %v359_v20 = vld [vmem:[%s1574_s4 + $0x78] sm:$0xff]  ;;  %v778_v21 = vpack.c.bf16 %v354_v18, %v352_v17  ;;  %v356_v23 = vld [vmem:[%s1574_s4 + $0x60] sm:$0xff] }
  0xad   : > { %773 = vmatprep.subr.bf16.mxu0 %v772_v10  ;;  %801 = vmatprep.subr.bf16.mxu1 %v772_v10  ;;  %v780_v22 = vpack.c.bf16 %v359_v20, %v357_v19  ;;  %v358_v24 = vld [vmem:[%s1574_s4 + $0x70] sm:$0xff]  ;;  %v361_v25 = vld [vmem:[%s1574_s4 + $0x88] sm:$0xff]  ;;  %v363_v26 = vld [vmem:[%s1574_s4 + $0x98] sm:$0xff] }
  0xae   : > { %v782_v27 = vpack.c.bf16 %v358_v24, %v356_v23  ;;  %v784_v28 = vpack.c.bf16 %v363_v26, %v361_v25  ;;  %v360_v29 = vld [vmem:[%s1574_s4 + $0x80] sm:$0xff]  ;;  %v362_v30 = vld [vmem:[%s1574_s4 + $0x90] sm:$0xff]  ;;  %v365_v31 = vld [vmem:[%s1574_s4 + $0xa8] sm:$0xff] }
  0xaf   : > { %v367_v32 = vld [vmem:[%s1574_s4 + $0xb8] sm:$0xff]  ;;  %v786_v33 = vpack.c.bf16 %v362_v30, %v360_v29  ;;  %v364_v35 = vld [vmem:[%s1574_s4 + $0xa0] sm:$0xff]  ;;  %v366_v36 = vld [vmem:[%s1574_s4 + $0xb0] sm:$0xff] }
  0xb0   : > { %775 = vmatpush1.bf16.msra.mxu0 %v774_v15  ;;  %809 = vmatpush1.bf16.msra.mxu1 %v774_v15  ;;  %v788_v34 = vpack.c.bf16 %v367_v32, %v365_v31  ;;  %v369_v37 = vld [vmem:[%s1574_s4 + $0xc8] sm:$0xff]  ;;  %v371_v38 = vld [vmem:[%s1574_s4 + $0xd8] sm:$0xff]  ;;  %v790_v39 = vpack.c.bf16 %v366_v36, %v364_v35  ;;  %v368_v41 = vld [vmem:[%s1574_s4 + $0xc0] sm:$0xff] }
  0xb1   : > { %777 = vmatprep.subr.bf16.mxu0 %v776_v16  ;;  %802 = vmatprep.subr.bf16.mxu1 %v776_v16  ;;  %v792_v40 = vpack.c.bf16 %v371_v38, %v369_v37  ;;  %v370_v42 = vld [vmem:[%s1574_s4 + $0xd0] sm:$0xff]  ;;  %v373_v43 = vld [vmem:[%s1574_s4 + $0xe8] sm:$0xff]  ;;  %v375_v44 = vld [vmem:[%s1574_s4 + $0xf8] sm:$0xff] }
  0xb2   : > { %v794_v45 = vpack.c.bf16 %v370_v42, %v368_v41  ;;  %v796_v46 = vpack.c.bf16 %v375_v44, %v373_v43  ;;  %v372_v47 = vld [vmem:[%s1574_s4 + $0xe0] sm:$0xff]  ;;  %v374_v48 = vld [vmem:[%s1574_s4 + $0xf0] sm:$0xff]  ;;  %v337_v52 = vld [vmem:[%s1566_s6 + $0x8] sm:$0xff]  ;;  %v543_v42 = vlaneseq (!%p760_p11) }
  0xb3   : > { %v798_v49 = vpack.c.bf16 %v374_v48, %v372_v47  ;;  %v336_v50 = vld [vmem:[%s1566_s6] sm:$0xff]  ;;  %v341_v53 = vld [vmem:[%s1566_s6 + $0x28] sm:$0xff]  ;;  %v338_v54 = vld [vmem:[%s1566_s6 + $0x10] sm:$0xff] }
  0xb4   : > { %779 = vmatpush1.bf16.msra.mxu0 %v778_v21  ;;  %810 = vmatpush1.bf16.msra.mxu1 %v778_v21  ;;  %v340_v51 = vld [vmem:[%s1566_s6 + $0x20] sm:$0xff]  ;;  %v342_v55 = vld [vmem:[%s1566_s6 + $0x30] sm:$0xff]  ;;  %v339_v56 = vld [vmem:[%s1566_s6 + $0x18] sm:$0xff]  ;;  %v544_v43 = vshrl.u32 (!%p760_p11), %v543_v42, 7 }
  0xb5   : > { %781 = vmatprep.subr.bf16.mxu0 %v780_v22  ;;  %803 = vmatprep.subr.bf16.mxu1 %v780_v22  ;;  %v343_v57 = vld [vmem:[%s1566_s6 + $0x38] sm:$0xff]  ;;  %v320_v58 = vld [vmem:[#allocation2] sm:$0xff]  ;;  %v321_v60 = vld [vmem:[#allocation2 + $0x8] sm:$0xff] }
  0xb6   : > { %v328_v59 = vld [vmem:[#allocation2 + $0x40] sm:$0xff]  ;;  %v329_v61 = vld [vmem:[#allocation2 + $0x48] sm:$0xff]  ;;  %v322_v6 = vld [vmem:[#allocation2 + $0x10] sm:$0xff]  ;;  %v549_v48 = vsub.s32 (!%p760_p11), 1, %v544_v43 }
  0xb7   : > { %v330_v7 = vld [vmem:[#allocation2 + $0x50] sm:$0xff]  ;;  %v331_v9 = vld [vmem:[#allocation2 + $0x58] sm:$0xff]  ;;  %v324_v18 = vld [vmem:[#allocation2 + $0x20] sm:$0xff] }
  0xb8   : > { %783 = vmatpush1.bf16.msra.mxu0 %v782_v27  ;;  %811 = vmatpush1.bf16.msra.mxu1 %v782_v27  ;;  %v332_v19 = vld [vmem:[#allocation2 + $0x60] sm:$0xff]  ;;  %v325_v20 = vld [vmem:[#allocation2 + $0x28] sm:$0xff]  ;;  %v326_v30 = vld [vmem:[#allocation2 + $0x30] sm:$0xff] }
  0xb9   : > { %785 = vmatprep.subr.bf16.mxu0 %v784_v28  ;;  %804 = vmatprep.subr.bf16.mxu1 %v784_v28  ;;  %v333_v21 = vld [vmem:[#allocation2 + $0x68] sm:$0xff]  ;;  %v334_v31 = vld [vmem:[#allocation2 + $0x70] sm:$0xff]  ;;  %v327_v32 = vld [vmem:[#allocation2 + $0x38] sm:$0xff] }
  0xbc   : > { %787 = vmatpush1.bf16.msra.mxu0 %v786_v33  ;;  %812 = vmatpush1.bf16.msra.mxu1 %v786_v33  ;;  %v335_v33 = vld [vmem:[#allocation2 + $0x78] sm:$0xff] }
  0xbd   : > { %789 = vmatprep.subr.bf16.mxu0 %v788_v34  ;;  %805 = vmatprep.subr.bf16.mxu1 %v788_v34 }
  0xc0   : > { %791 = vmatpush1.bf16.msra.mxu0 %v790_v39  ;;  %813 = vmatpush1.bf16.msra.mxu1 %v790_v39 }
  0xc1   : > { %793 = vmatprep.subr.bf16.mxu0 %v792_v40  ;;  %806 = vmatprep.subr.bf16.mxu1 %v792_v40 }
  0xc4   : > { %795 = vmatpush1.bf16.msra.mxu0 %v794_v45  ;;  %814 = vmatpush1.bf16.msra.mxu1 %v794_v45  ;;  %v541_v45 = vld [vmem:[%s1584_s1] sm:$0x3] (!%p760_p11) }
  0xc5   : > { %797 = vmatprep.subr.bf16.mxu0 %v796_v46  ;;  %807 = vmatprep.subr.bf16.mxu1 %v796_v46  ;;  %v545_v46 = vsub.s32 (!%p760_p11), 0, %v544_v43 }
  0xc8   : > { %799 = vmatpush1.bf16.msra.mxu0 %v798_v49  ;;  %815 = vmatpush1.bf16.msra.mxu1 %v798_v49 }
  0xcb   : > { %441 = vmatmul.mubr.f32.vlgmr.msra.gmra.mrb[0].mxu0 %v336_v50  ;;  %465 = vmatmul.mubr.f32.vlgmr.msra.gmra.mrb[0].mxu1 %v340_v51 }
  0xcc   : > { %446 = vmatprep.mubr.f32.mxu0 %v1218_v8  ;;  %470 = vmatprep.mubr.f32.mxu1 %v1218_v8 }
  0xcf   : > { %447 = vmatmul.mubr.f32.gmra.mrb[2].mxu0 %v337_v52  ;;  %471 = vmatmul.mubr.f32.gmra.mrb[2].mxu1 %v341_v53 }
  0xd0   : > { %452 = vmatprep.mubr.f32.mxu0 %v1218_v8  ;;  %476 = vmatprep.mubr.f32.mxu1 %v1218_v8 }
  0xd3   : > { %453 = vmatmul.mubr.f32.gmra.mrb[4].mxu0 %v338_v54  ;;  %477 = vmatmul.mubr.f32.gmra.mrb[4].mxu1 %v342_v55  ;;  %v546_v54 = vrot.slane (!%p760_p11), %v541_v45, %v545_v46  ;;  %v550_v55 = vrot.slane (!%p760_p11), %v541_v45, %v549_v48 }
  0xd4   : > { %458 = vmatprep.mubr.f32.mxu0 %v1218_v8  ;;  %482 = vmatprep.mubr.f32.mxu1 %v1218_v8  ;;  %v323_v8 = vld [vmem:[#allocation2 + $0x18] sm:$0xff] }
  0xd7   : > { %459 = vmatmul.mubr.f32.gmra.mrb[6].mxu0 %v339_v56  ;;  %483 = vmatmul.mubr.f32.gmra.mrb[6].mxu1 %v343_v57 }
 0x19e   : > { %v442_v62 = vpop.f32.mrb[0].mxu0  ;;  %v466_v63 = vpop.f32.mrb[0].mxu1 }
 0x19f   : > { %v489_v0 = vadd.f32 %v442_v62, %v320_v58  ;;  %v497_v1 = vadd.f32 %v466_v63, %v328_v59  ;;  %v444_v2 = vpop.f32.mrb[1].mxu0  ;;  %v468_v3 = vpop.f32.mrb[1].mxu1 }
 0x1a0   : > { %v490_v4 = vadd.f32 %v444_v2, %v321_v60  ;;  %v498_v5 = vadd.f32 %v468_v3, %v329_v61 }
 0x1a1   : > { %505 = vst [vmem:[#allocation2] sm:$0xff] %v489_v0  ;;  %513 = vst [vmem:[#allocation2 + $0x40] sm:$0xff] %v497_v1 }
 0x1a2   : > { %506 = vst [vmem:[#allocation2 + $0x8] sm:$0xff] %v490_v4  ;;  %514 = vst [vmem:[#allocation2 + $0x48] sm:$0xff] %v498_v5  ;;  %v448_v10 = vpop.f32.mrb[2].mxu0  ;;  %v472_v11 = vpop.f32.mrb[2].mxu1 }
 0x1a3   : > { %v491_v12 = vadd.f32 %v448_v10, %v322_v6  ;;  %v499_v13 = vadd.f32 %v472_v11, %v330_v7  ;;  %v450_v14 = vpop.f32.mrb[3].mxu0  ;;  %v474_v15 = vpop.f32.mrb[3].mxu1 }
 0x1a4   : > { %v492_v16 = vadd.f32 %v450_v14, %v323_v8  ;;  %v500_v17 = vadd.f32 %v474_v15, %v331_v9 }
 0x1a5   : > { %507 = vst [vmem:[#allocation2 + $0x10] sm:$0xff] %v491_v12  ;;  %515 = vst [vmem:[#allocation2 + $0x50] sm:$0xff] %v499_v13 }
 0x1a6   : > { %508 = vst [vmem:[#allocation2 + $0x18] sm:$0xff] %v492_v16  ;;  %516 = vst [vmem:[#allocation2 + $0x58] sm:$0xff] %v500_v17  ;;  %v454_v22 = vpop.f32.mrb[4].mxu0  ;;  %v478_v23 = vpop.f32.mrb[4].mxu1 }
 0x1a7   : > { %v493_v24 = vadd.f32 %v454_v22, %v324_v18  ;;  %v501_v25 = vadd.f32 %v478_v23, %v332_v19  ;;  %v456_v26 = vpop.f32.mrb[5].mxu0  ;;  %v480_v27 = vpop.f32.mrb[5].mxu1 }
 0x1a8   : > { %v494_v28 = vadd.f32 %v456_v26, %v325_v20  ;;  %v502_v29 = vadd.f32 %v480_v27, %v333_v21  ;;  %524 = sbr.rel (%p760_p11) target bundleno = 442 (0x1ba), region = 52  ;;  %v525_v44 = vld [vmem:[#allocation2] sm:$0xff] (!%p760_p11) }
 0x1a9   : > { %509 = vst [vmem:[#allocation2 + $0x20] sm:$0xff] %v493_v24  ;;  %517 = vst [vmem:[#allocation2 + $0x60] sm:$0xff] %v501_v25  ;;  %v526_v47 = vld [vmem:[#allocation2 + $0x8] sm:$0xff] (!%p760_p11)  ;;  %v533_v57 = vld [vmem:[#allocation2 + $0x40] sm:$0xff] (!%p760_p11)  ;;  %v553_v62 = vadd.f32 (!%p760_p11), %v546_v54, %v525_v44 }
 0x1aa   : > { %510 = vst [vmem:[#allocation2 + $0x28] sm:$0xff] %v494_v28  ;;  %518 = vst [vmem:[#allocation2 + $0x68] sm:$0xff] %v502_v29  ;;  %v460_v34 = vpop.f32.mrb[6].mxu0  ;;  %v484_v35 = vpop.f32.mrb[6].mxu1  ;;  %v534_v58 = vld [vmem:[#allocation2 + $0x48] sm:$0xff] (!%p760_p11)  ;;  %v554_v63 = vadd.f32 (!%p760_p11), %v550_v55, %v526_v47  ;;  %v561_v9 = vadd.f32 (!%p760_p11), %v546_v54, %v533_v57 }
 0x1ab   : > { %v495_v36 = vadd.f32 %v460_v34, %v326_v30  ;;  %v503_v37 = vadd.f32 %v484_v35, %v334_v31  ;;  %v462_v38 = vpop.f32.mrb[7].mxu0  ;;  %v486_v39 = vpop.f32.mrb[7].mxu1  ;;  %569 = vst [vmem:[%s1591_s29] sm:$0xff] (!%p760_p11), %v553_v62  ;;  %v562_v10 = vadd.f32 (!%p760_p11), %v550_v55, %v534_v58 }
 0x1ac   : > { %v496_v40 = vadd.f32 %v462_v38, %v327_v32  ;;  %v504_v41 = vadd.f32 %v486_v39, %v335_v33  ;;  %v527_v49 = vld [vmem:[#allocation2 + $0x10] sm:$0xff] (!%p760_p11)  ;;  %570 = vst [vmem:[%s1591_s29 + $0x8] sm:$0xff] (!%p760_p11), %v554_v63  ;;  %577 = vst [vmem:[%s1591_s29 + $0x40] sm:$0xff] (!%p760_p11), %v561_v9 }
 0x1ad   : > { %511 = vst [vmem:[#allocation2 + $0x30] sm:$0xff] %v495_v36  ;;  %519 = vst [vmem:[#allocation2 + $0x70] sm:$0xff] %v503_v37  ;;  %v528_v50 = vld [vmem:[#allocation2 + $0x18] sm:$0xff] (!%p760_p11)  ;;  %v535_v59 = vld [vmem:[#allocation2 + $0x50] sm:$0xff] (!%p760_p11)  ;;  %v555_v0 = vadd.f32 (!%p760_p11), %v546_v54, %v527_v49 }
 0x1ae   : > { %512 = vst [vmem:[#allocation2 + $0x38] sm:$0xff] %v496_v40  ;;  %520 = vst [vmem:[#allocation2 + $0x78] sm:$0xff] %v504_v41  ;;  %v536_v60 = vld [vmem:[#allocation2 + $0x58] sm:$0xff] (!%p760_p11)  ;;  %v556_v1 = vadd.f32 (!%p760_p11), %v550_v55, %v528_v50  ;;  %v563_v11 = vadd.f32 (!%p760_p11), %v546_v54, %v535_v59 }
 0x1af   : > { %571 = vst [vmem:[%s1591_s29 + $0x10] sm:$0xff] %v555_v0  ;;  %v564_v12 = vadd.f32 %v550_v55, %v536_v60  ;;  %578 = vst [vmem:[%s1591_s29 + $0x48] sm:$0xff] %v562_v10 }
 0x1b0   : > { %v529_v51 = vld [vmem:[#allocation2 + $0x20] sm:$0xff]  ;;  %572 = vst [vmem:[%s1591_s29 + $0x18] sm:$0xff] %v556_v1  ;;  %579 = vst [vmem:[%s1591_s29 + $0x50] sm:$0xff] %v563_v11 }
 0x1b1   : > { %v530_v52 = vld [vmem:[#allocation2 + $0x28] sm:$0xff]  ;;  %v537_v61 = vld [vmem:[#allocation2 + $0x60] sm:$0xff]  ;;  %v557_v5 = vadd.f32 %v546_v54, %v529_v51  ;;  %580 = vst [vmem:[%s1591_s29 + $0x58] sm:$0xff] %v564_v12 }
 0x1b2   : > { %v538_v2 = vld [vmem:[#allocation2 + $0x68] sm:$0xff]  ;;  %v558_v6 = vadd.f32 %v550_v55, %v530_v52  ;;  %v565_v13 = vadd.f32 %v546_v54, %v537_v61 }
 0x1b3   : > { %573 = vst [vmem:[%s1591_s29 + $0x20] sm:$0xff] %v557_v5  ;;  %v566_v14 = vadd.f32 %v550_v55, %v538_v2 }
 0x1b4   : > { %v531_v53 = vld [vmem:[#allocation2 + $0x30] sm:$0xff]  ;;  %574 = vst [vmem:[%s1591_s29 + $0x28] sm:$0xff] %v558_v6  ;;  %581 = vst [vmem:[%s1591_s29 + $0x60] sm:$0xff] %v565_v13 }
 0x1b5   : > { %v532_v56 = vld [vmem:[#allocation2 + $0x38] sm:$0xff]  ;;  %v539_v3 = vld [vmem:[#allocation2 + $0x70] sm:$0xff]  ;;  %v559_v7 = vadd.f32 %v546_v54, %v531_v53  ;;  %582 = vst [vmem:[%s1591_s29 + $0x68] sm:$0xff] %v566_v14 }
 0x1b6   : > { %v540_v4 = vld [vmem:[#allocation2 + $0x78] sm:$0xff]  ;;  %v560_v8 = vadd.f32 %v550_v55, %v532_v56  ;;  %v567_v15 = vadd.f32 %v546_v54, %v539_v3 }
 0x1b7   : > { %575 = vst [vmem:[%s1591_s29 + $0x30] sm:$0xff] %v559_v7  ;;  %v568_v16 = vadd.f32 %v550_v55, %v540_v4 }
 0x1b8   : > { %576 = vst [vmem:[%s1591_s29 + $0x38] sm:$0xff] %v560_v8  ;;  %583 = vst [vmem:[%s1591_s29 + $0x70] sm:$0xff] %v567_v15 }
 0x1b9   : > { %584 = vst [vmem:[%s1591_s29 + $0x78] sm:$0xff] %v568_v16 }
 0x1ba PF: > { %s1798_s21 = sld [smem:[#allocation14_spill]]  ;;  %s1799_s30 = sld [smem:[#allocation22_spill]] }
 0x1bb   : > { %s602_s24 = sshll.u32 %s1591_s29, 4  ;;  %s586_s6 = scalar_lea.sflag [#allocation5], %s1581_s3  ;;  %s1667_s24 = int_to_ptr.vmem [resolvable:$true] %s602_s24 }
 0x1bc   : > { %s1053_s9 = scalar_lea.vmem %s1667_s24, 2048  ;;  %p1800_p5 = scmp.ne.s32.totalorder %s1790_s10, 0 }
 0x1bd   : > { %p1054_p13 = scmp.ne.s32.totalorder %s1667_s24, %s1053_s9  ;;  %s1219_s23 = smov [#allocation9]  }
 0x1be   : > { %s1057_s5 = sshll.u32 %s1219_s23, 4  ;;  %s1058_s5 = int_to_ptr.vmem [resolvable:$false] %s1057_s5 }
 0x1bf   : > { %p1055_p2 = pnand %p1054_p13, %p1800_p5  ;;  %s1059_s26 = scalar_lea.vmem %s1058_s5, 4096 }
 0x1c0   : > { %s767_s28 = sshll.u32 %s1798_s21, 8  ;;  %p1060_p3 = scmp.lt.s32.totalorder %s1667_s24, %s1058_s5 }
 0x1c1   : > { %s1664_s18 = scalar_lea.hbm %s1799_s30, %s767_s28  ;;  %p1056_p6 = pneg %p1055_p2 }
 0x1c2   : > { %p1061_p4 = scmp.lt.s32.totalorder %s1059_s26, %s1053_s9 }
 0x1c4   : > { %p1062_p7 = por %p1061_p4, %p1060_p3 }
 0x1c6   : > { %p1063_p8 = pnand %p1062_p7, %p1056_p6 }
 0x1c8   : > { %1066 = shalt.err (!%p1063_p8)
}
 0x1c9   : > { %s1067_s4 = scalar_lea.hbm %s1664_s18, 2048  ;;  %s1071_s8 = scalar_lea.hbm %s1799_s30, 10240 }
 0x1ca   : > { %p1068_p9 = scmp.ne.s32.totalorder %s1664_s18, %s1067_s4  ;;  %p1072_p0 = scmp.lt.u32.totalorder %s1664_s18, %s1799_s30 }
 0x1cb   : > { %p1073_p12 = scmp.lt.u32.totalorder %s1071_s8, %s1067_s4  ;;  %p1075_p13 = scmp.lt.u32.totalorder %s1067_s4, %s1664_s18 }
 0x1cc   : > { %p1069_p10 = pnand %p1068_p9, %p1800_p5 }
 0x1cd   : > { %p1074_p11 = por %p1073_p12, %p1072_p0 }
 0x1ce   : > { %p1070_p1 = pneg %p1069_p10 }
 0x1cf   : > { %p1076_p2 = por %p1075_p13, %p1074_p11 }
 0x1d1   : > { %p1077_p6 = pnand %p1076_p2, %p1070_p1 }
 0x1d3   : > { %1080 = shalt.err (!%p1077_p6)
}
 0x1d4   : > { %s1220_s28 = smov 256   ;;  %s1221_s27 = smov 1280  }
 0x1d5   : > { %s1222_s0 = smov 16  }
 0x1d6   : > { %823 = dma.vmem_to_hbm [thread:$0]  (%p1800_p5), %s1667_s24, 2048, %s1664_s18, %s586_s6, %s1220_s28, %s1221_s27, %s1222_s0  }
 0x1d7 PF: > { %p840_p3 = scmp.ge.s32.totalorder %s1207_s25, 2  ;;  %s617_s9 = sand.u32 1, %s1155_s12  }
 0x1d8   : > { %p1801_p4 = scmp.ne.s32.totalorder %s1791_s15, 0  ;;  %s618_s23 = scalar_lea.sflag [#allocation5], %s617_s9 }
 0x1da   : > { %p836_p7 = pnand %p840_p3, %p1801_p4 }
 0x1dc   : > { %1150 = dma.done.wait (!%p836_p7), %s618_s23, 2048  }
 0x1dd   : > { %1152 = vsyncadd (!%p836_p7), %s618_s23, 4294965248  ;;  %s22_s25 = sadd.s32 1, %s1207_s25   ;;  %s1803_s10 = sld [smem:[#allocation18_spill]] }
 0x1de   : > { %p1698_p8 = scmp.ge.s32.totalorder %s22_s25, 12   ;;  %s1804_s21 = sld [smem:[#allocation15_spill]] }
 0x1df   : > { %s1805_s22 = sld [smem:[#allocation16_spill]]  ;;  %s1806_s23 = sld [smem:[#allocation17_spill]] }
 0x1e0   : > { %s1807_s24 = sld [smem:[#allocation19_spill]]  ;;  %s1808_s12 = smov %s1159_s13 }
 0x1e1   : > { %s1809_s13 = smov %s1163_s14  ;;  %s1810_s14 = smov %s1505_s7 }
 0x1e2   : > { %s1811_s15 = smov %s1171_s16  ;;  %s1812_s16 = smov %s1175_s17 }
 0x1e3   : > { %s1813_s17 = smov %s1510_s11  ;;  %s1814_s18 = smov %s1183_s19 }
 0x1e4   : > { %s1815_s19 = smov %s1187_s20  ;;  %s1816_s20 = smov %s1803_s10 }
 0x1e5   :  { %21 = sbr.rel (!%p1698_p8) target bundleno = 16 (0x10), region = 109 }
 0x1ec   :  { %623 = vsyncpa [#allocation4], 1 }
 0x1ed   :  { %625 = vsyncpa [#allocation4 + $0x1], 1 }
 0x1ee   :  { %626 = vsyncpa [#allocation7], 1 }
 0x1ef   :  { %628 = vsyncpa [#allocation7 + $0x1], 1 }
 0x1f0   :  { %629 = vsyncpa [#allocation5], 1 }
 0x1f1   :  { %631 = vsyncpa [#allocation5 + $0x1], 1 }

</bundles_post_ra>
